<compile_context>
chip_gen: v7x
topology: tpu7x:2x2x1
jax: 0.10.0
libtpu: 0.0.40
codegen_flags: <defaults>
</compile_context>

<pallas_src>
import math

import jax
import jax.numpy as jnp
from jax import lax
from jax.experimental import pallas as pl
from jax.experimental.pallas import tpu as pltpu


def _round_up(a, b):
    return (a + b - 1) // b * b


def _choose_tm(Mp, n_images, K, C_out, itemsize, vmem_budget, tm_cap_lanes):
    """Pick the per-step lane-tile size tm (multiple of 128) for M' = Ho*Wo."""
    mp128 = _round_up(Mp, 128)
    # Per-lane VMEM bytes of one grid step: double-buffered x tile (K rows)
    # and out tile (C_out rows), plus ~4 full-size f32 GELU temporaries
    # (acc, erf argument, erf result, product).  Weight/bias are tiny.
    per_lane = 2 * itemsize * (K + C_out) + 4 * 4 * C_out
    tm_cap = max(128, (min(tm_cap_lanes, vmem_budget // per_lane) // 128) * 128)
    tm = min(tm_cap, mp128)
    nsteps = pl.cdiv(Mp, tm)
    # v7x has 2 TensorCores sharing the "parallel" grid axes: keep the total
    # step count even so the cores get balanced work.  Harmless (one cheap
    # extra step at most) on single-TC v5e/v6e.
    max_steps = mp128 // 128
    if (n_images * nsteps) % 2 == 1 and nsteps + 1 <= max_steps:
        nsteps += 1
    # Re-balance so the ragged last tile is not much smaller than the rest.
    tm = max(128, min(tm, _round_up(pl.cdiv(Mp, nsteps), 128)))
    return tm


def _make_patch_proj_gelu_kernel(approximate):
    def kernel(xt_ref, wt_ref, b_ref, o_ref):
        # xt_ref: (K, TM) patch columns   wt_ref: (C_out, K)   b_ref: (C_out, 1)
        # o_ref:  (C_out, TM)             (TM is a multiple of 128 -> lane-dense)
        acc = jnp.dot(wt_ref[...], xt_ref[...],
                      preferred_element_type=jnp.float32)
        acc = acc + b_ref[...].astype(jnp.float32)          # lane broadcast
        if approximate:
            # tanh-approx GELU: transcendental goes to the EUP slot (useful if
            # v7x becomes VALU-bound).  NOTE: does not bit-match nn.GELU.
            c = 0.7978845608028654  # sqrt(2/pi)
            gelu = 0.5 * acc * (1.0 + jnp.tanh(c * (acc + 0.044715 * acc * acc * acc)))
        else:
            # Exact GELU (PyTorch nn.GELU default): 0.5*x*(1+erf(x/sqrt(2)))
            gelu = 0.5 * acc * (1.0 + lax.erf(acc * 0.7071067811865476))
        o_ref[...] = gelu.astype(o_ref.dtype)
    return kernel


def _patch_proj_gelu(xt, wt, bt, *, approximate_gelu=False,
                     tm_cap_lanes=32768, vmem_budget=16 * 1024 * 1024):
    """xt: (N, K, M'), wt: (C_out, K), bt: (C_out, 1) -> (N, C_out, M')."""
    N, K, Mp = xt.shape
    C_out = wt.shape[0]
    itemsize = jnp.dtype(xt.dtype).itemsize

    tm = _choose_tm(Mp, N, K, C_out, itemsize, vmem_budget, tm_cap_lanes)
    grid = (N, pl.cdiv(Mp, tm))

    kernel = _make_patch_proj_gelu_kernel(approximate_gelu)

    return pl.pallas_call(
        kernel,
        out_shape=jax.ShapeDtypeStruct((N, C_out, Mp), xt.dtype),
        grid_spec=pltpu.PrefetchScalarGridSpec(
            num_scalar_prefetch=0,
            grid=grid,
            in_specs=[
                # Per-image patch columns; ragged last M-tile is masked by the
                # pipeline (no HBM padding).
                pl.BlockSpec((None, K, tm), lambda n, i: (n, 0, i)),
                pl.BlockSpec((C_out, K), lambda n, i: (0, 0)),   # weight (invariant)
                pl.BlockSpec((C_out, 1), lambda n, i: (0, 0)),   # bias   (invariant)
            ],
            out_specs=pl.BlockSpec((None, C_out, tm), lambda n, i: (n, 0, i)),
        ),
        compiler_params=pltpu.CompilerParams(
            dimension_semantics=("parallel", "parallel"),
            vmem_limit_bytes=32 * 1024 * 1024,
        ),
        cost_estimate=pl.CostEstimate(
            flops=2 * N * Mp * K * C_out,
            transcendentals=N * Mp * C_out,
            bytes_accessed=itemsize * (N * Mp * K + C_out * K + C_out
                                       + N * Mp * C_out),
        ),
    )(xt, wt, bt)


def downsample_forward(x, weight, bias, scale, *, approximate_gelu=False):
    """Equivalent of DownSample.forward.

    x:      (N, C_in, H, W)          NCHW, like PyTorch
    weight: (C_out, C_in, s, s)      PyTorch Conv2d (OIHW) weight layout
    bias:   (C_out,)
    returns (N, C_out, H//s, W//s)
    """
    N, C_in, H, W = x.shape
    C_out = weight.shape[0]
    s = scale
    Ho, Wo = H // s, W // s
    # PyTorch Conv2d with stride==kernel floors: drop trailing rows/cols.
    if H != Ho * s or W != Wo * s:
        x = x[:, :, :Ho * s, :Wo * s]
    Mp = Ho * Wo
    K = C_in * s * s

    # Per-image im2col with the output-pixel axis on lanes:
    # (N, C_in, Ho, s, Wo, s) -> (N, C_in, s, s, Ho, Wo) -> (N, K, M')
    # K ordering (C_in, kh, kw) matches the OIHW weight layout.
    # TODO(synk): fuse this transpose into the kernel to kill one HBM pass.
    xp = x.reshape(N, C_in, Ho, s, Wo, s)
    xp = jnp.transpose(xp, (0, 1, 3, 5, 2, 4))
    xt = xp.reshape(N, K, Mp)

    wt = weight.reshape(C_out, K)          # (C_out, K)
    bt = bias.reshape(C_out, 1)            # (C_out, 1)

    out = _patch_proj_gelu(xt, wt, bt, approximate_gelu=approximate_gelu)
    # (N, C_out, M') -> NCHW is a pure reshape (no transpose, no HBM copy).
    return out.reshape(N, C_out, Ho, Wo)


def _reference(x, weight, bias, scale):
    # Pure-JAX reference: conv (NCHW, OIHW) + exact GELU.
    y = lax.conv_general_dilated(
        x, weight, window_strides=(scale, scale), padding="VALID",
        dimension_numbers=("NCHW", "OIHW", "NCHW"))
    y = y + bias.reshape(1, -1, 1, 1)
    return jax.nn.gelu(y, approximate=False)


if __name__ == "__main__":
    key = jax.random.PRNGKey(0)
    k_x, k_w, k_b = jax.random.split(key, 3)

    N, C_in, H, W = 2, 4, 32, 32
    C_out, scale = 8, 2

    x = jax.random.normal(k_x, (N, C_in, H, W), dtype=jnp.float32)

    # Deterministic param init, mimicking PyTorch Conv2d default (uniform in
    # +/- 1/sqrt(fan_in)).
    fan_in = C_in * scale * scale
    bound = 1.0 / math.sqrt(fan_in)
    weight = jax.random.uniform(k_w, (C_out, C_in, scale, scale),
                                minval=-bound, maxval=bound, dtype=jnp.float32)
    bias = jax.random.uniform(k_b, (C_out,), minval=-bound, maxval=bound,
                              dtype=jnp.float32)

    out = downsample_forward(x, weight, bias, scale)
    out = jax.block_until_ready(out)

    ref = jax.block_until_ready(_reference(x, weight, bias, scale))
    assert out.shape == (N, C_out, H // scale, W // scale), out.shape
    assert jnp.allclose(out, ref, atol=1e-5, rtol=1e-5), float(
        jnp.max(jnp.abs(out - ref)))

    print("KERNEL_OK")
</pallas_src>

<mosaic_0001>
module attributes {stable_mosaic.version = 11 : i64} {
  func.func @kernel(%arg0: i32, %arg1: i32, %arg2: memref<1x16x256xf32, #tpu.memory_space<vmem>>, %arg3: memref<8x16xf32, #tpu.memory_space<vmem>>, %arg4: memref<8x1xf32, #tpu.memory_space<vmem>>, %arg5: memref<1x8x256xf32, #tpu.memory_space<vmem>>) attributes {dimension_semantics = [#tpu.dimension_semantics<parallel>, #tpu.dimension_semantics<parallel>], iteration_bounds = array<i64: 2, 1>, scalar_prefetch = 0 : i64, scratch_operands = 0 : i64, tpu.core_type = #tpu.core_type<tc>, window_params = [{transform_indices = @transform_0, window_bounds = array<i64: 1, 16, 256>}, {pipeline_mode = #tpu.pipeline_mode<synchronous>, transform_indices = @transform_1, window_bounds = array<i64: 8, 16>}, {pipeline_mode = #tpu.pipeline_mode<synchronous>, transform_indices = @transform_2, window_bounds = array<i64: 8, 1>}, {transform_indices = @transform_3, window_bounds = array<i64: 1, 8, 256>}]} {
    %c0 = arith.constant 0 : index
    %c0_0 = arith.constant 0 : index
    %0 = vector.load %arg3[%c0, %c0_0] : memref<8x16xf32, #tpu.memory_space<vmem>>, vector<8x16xf32>
    %c0_1 = arith.constant 0 : index
    %c0_2 = arith.constant 0 : index
    %c0_3 = arith.constant 0 : index
    %1 = vector.load %arg2[%c0_1, %c0_2, %c0_3] : memref<1x16x256xf32, #tpu.memory_space<vmem>>, vector<1x16x256xf32>
    %2 = vector.shape_cast %1 : vector<1x16x256xf32> to vector<16x256xf32>
    %cst = arith.constant dense<0.000000e+00> : vector<8x256xf32>
    %3 = tpu.matmul %0, %2, %cst {dimension_numbers = #tpu.dot_dimension_numbers<[1], [0], [0], [1], [0, 0, 1, 1], [], []>} : vector<8x16xf32>, vector<16x256xf32>, vector<8x256xf32> -> vector<8x256xf32>
    %c0_4 = arith.constant 0 : index
    %c0_5 = arith.constant 0 : index
    %4 = vector.load %arg4[%c0_4, %c0_5] : memref<8x1xf32, #tpu.memory_space<vmem>>, vector<8x1xf32>
    %5 = vector.broadcast %4 : vector<8x1xf32> to vector<8x256xf32>
    %6 = arith.addf %3, %5 : vector<8x256xf32>
    %cst_6 = arith.constant 5.000000e-01 : f32
    %7 = vector.broadcast %cst_6 : f32 to vector<8x256xf32>
    %8 = arith.mulf %7, %6 : vector<8x256xf32>
    %cst_7 = arith.constant 0.707106769 : f32
    %9 = vector.broadcast %cst_7 : f32 to vector<8x256xf32>
    %10 = arith.mulf %6, %9 : vector<8x256xf32>
    %11 = math.erf %10 : vector<8x256xf32>
    %cst_8 = arith.constant 1.000000e+00 : f32
    %12 = vector.broadcast %cst_8 : f32 to vector<8x256xf32>
    %13 = arith.addf %12, %11 : vector<8x256xf32>
    %14 = arith.mulf %8, %13 : vector<8x256xf32>
    %c0_9 = arith.constant 0 : index
    %c0_10 = arith.constant 0 : index
    %c0_11 = arith.constant 0 : index
    %15 = vector.load %arg5[%c0_9, %c0_10, %c0_11] : memref<1x8x256xf32, #tpu.memory_space<vmem>>, vector<1x8x256xf32>
    %16 = vector.shape_cast %15 : vector<1x8x256xf32> to vector<8x256xf32>
    %17 = vector.shape_cast %14 : vector<8x256xf32> to vector<1x8x256xf32>
    tpu.vector_store %arg5[%c0_9, %c0_10, %c0_11], %17 {strides = array<i32>} : memref<1x8x256xf32, #tpu.memory_space<vmem>>, vector<1x8x256xf32>,
    return
  }
  func.func @transform_0(%arg0: i32, %arg1: i32) -> (i32, i32, i32) {
    %c0_i32 = arith.constant 0 : i32
    %c0_i32_0 = arith.constant 0 : i32
    return %arg0, %c0_i32, %arg1 : i32, i32, i32
  }
  func.func @transform_1(%arg0: i32, %arg1: i32) -> (i32, i32) {
    %c0_i32 = arith.constant 0 : i32
    %c0_i32_0 = arith.constant 0 : i32
    %c0_i32_1 = arith.constant 0 : i32
    return %c0_i32, %c0_i32_0 : i32, i32
  }
  func.func @transform_2(%arg0: i32, %arg1: i32) -> (i32, i32) {
    %c0_i32 = arith.constant 0 : i32
    %c0_i32_0 = arith.constant 0 : i32
    %c0_i32_1 = arith.constant 0 : i32
    return %c0_i32, %c0_i32_0 : i32, i32
  }
  func.func @transform_3(%arg0: i32, %arg1: i32) -> (i32, i32, i32) {
    %c0_i32 = arith.constant 0 : i32
    %c0_i32_0 = arith.constant 0 : i32
    return %arg0, %c0_i32, %arg1 : i32, i32, i32
  }
}

</mosaic_0001>

<bundles_post_ra>
// kernel: tpu_custom_call.1
= control target key start
LH: loop header
LB: loop body
LE: loop exit
PB: predicated region body
PF: predicated region fallthrough
CT: control target
= control target key end

     0   :  { %8 = vsyncpa [#allocation3], 0  ;;  %s821_s0 = inlined_call_operand.hbm [shape: f32[2,16,256], index: 0, kind: input, shape index: {}]   ;;  %s822_s1 = inlined_call_operand.vmem [shape: f32[8,16], index: 1, kind: input, shape index: {}]   ;;  %s823_s2 = inlined_call_operand.vmem [shape: f32[8,1], index: 2, kind: input, shape index: {}]   ;;  %s824_s3 = inlined_call_operand.hbm [shape: f32[2,8,256], index: 3, kind: output, shape index: {}]  }
   0x1   :  { %10 = vsyncpa [#allocation3 + $0x1], 0 }
   0x2   :  { %11 = vsyncpa [#allocation4], 0 }
   0x3   :  { %13 = vsyncpa [#allocation4 + $0x1], 0  ;;  %s641_s12 = smov 0   ;;  %s643_s13 = smov 0  }
   0x4   :  { %s645_s14 = smov 0   ;;  %s647_s15 = smov 0  }
   0x5   :  { %s649_s16 = smov 0   ;;  %s651_s17 = smov 0  }
   0x6 LB: > { %s408_s18 = sadd.s32 4294967295, %s613_s17   ;;  %s409_s19 = sadd.s32 4294967294, %s613_s17   ;;  %s613_s17 = sphi %s651_s17, %s19_s17   ;;  %s609_s16 = sphi %s649_s16, %s839_s16   ;;  %s605_s15 = sphi %s647_s15, %s838_s15   ;;  %s601_s14 = sphi %s645_s14, %s837_s14   ;;  %s597_s13 = sphi %s643_s13, %s836_s13   ;;  %s593_s12 = sphi %s641_s12, %s835_s12  }
   0x7   : > { %s31_s20 = sadd.s32 1, %s609_s16  ;;  %s40_s21 = sadd.s32 1, %s601_s14 }
   0x8   : > { %p33_p0 = scmp.ge.s32.totalorder %s31_s20, 2  ;;  %p47_p1 = scmp.ne.s32.totalorder %s601_s14, %s597_s13 }
   0x9   : > { %p48_p2 = scmp.eq.s32.totalorder %s613_s17, 0  ;;  %p53_p3 = scmp.ne.s32.totalorder %s597_s13, %s593_s12 }
   0xa   : > { %s841_s20 = smov (%p33_p0, %s31_s20), 0  ;;  %p54_p5 = scmp.eq.s32.totalorder %s408_s18, 0 }
   0xb   : > { %p682_p4 = por %p48_p2, %p47_p1  ;;  %s35_s23 = ssub.s32 %s609_s16, %s841_s20 }
   0xc   : > { %p121_p6 = scmp.eq.s32.totalorder %s408_s18, 1  ;;  %p38_p7 = scmp.eq.s32.totalorder %s35_s23, 0 }
   0xd   : > { %p688_p8 = por %p54_p5, %p53_p3  ;;  %p127_p10 = scmp.eq.s32.totalorder %s409_s19, 1 }
   0xe   : > { %p692_p9 = por %p121_p6, %p47_p1  ;;  %p442_p13 = scmp.lt.s32.totalorder %s613_s17, 2 }
   0xf   : > { %s697_s26 = scalar_select %p38_p7, %s601_s14, %s40_s21  }
  0x10   : > { %s828_s25 = scalar_select %p692_p9, 1, 0 }
  0x11   : > { %p699_p11 = por %p127_p10, %p53_p3  ;;  %s153_s28 = sand.u32 1, %s601_s14  }
  0x12   : > { %s412_s29 = sshll.u32 %s153_s28, 5  ;;  %s424_s30 = sshll.u32 %s609_s16, 9 }
  0x13   : > { %s829_s27 = scalar_select %p699_p11, 1, 0 }
  0x14   : > { %s710_s6 = scalar_lea.hbm %s821_s0, %s424_s30  ;;  %s157_s7 = scalar_lea.vmem [#allocation2], %s412_s29 }
  0x15   : > { %s166_s8 = sshll.u32 %s157_s7, 4  ;;  %p716_p0 = pnand %p442_p13, %p682_p4  ;;  %s712_s8 = int_to_ptr.vmem [resolvable:$true] %s166_s8 }
  0x16   : > { %s721_s10 = scalar_lea.sflag [#allocation3], %s153_s28  ;;  %s501_s11 = scalar_lea.hbm %s710_s6, 512 }
  0x17   : > { %p502_p2 = scmp.ne.s32.totalorder %s710_s6, %s501_s11  ;;  %p503_p3 = pneg %p716_p0 }
  0x18   : > { %s506_s21 = scalar_lea.hbm %s821_s0, 1024  ;;  %p507_p4 = scmp.lt.u32.totalorder %s710_s6, %s821_s0 }
  0x19   : > { %p504_p5 = pnand %p503_p3, %p502_p2  ;;  %p508_p7 = scmp.lt.u32.totalorder %s506_s21, %s501_s11 }
  0x1a   : > { %p510_p13 = scmp.lt.u32.totalorder %s501_s11, %s710_s6 }
  0x1b   : > { %p505_p6 = pneg %p504_p5  ;;  %p509_p10 = por %p508_p7, %p507_p4 }
  0x1d   : > { %p511_p12 = por %p510_p13, %p509_p10 }
  0x1f   : > { %p512_p1 = pnand %p511_p12, %p505_p6 }
  0x21   : > { %515 = shalt.err (!%p512_p1)
}
  0x22   : > { %s516_s28 = scalar_lea.vmem %s712_s8, 512  ;;  %s615_s29 = smov [#allocation2]  }
  0x23   : > { %p517_p2 = scmp.ne.s32.totalorder %s712_s8, %s516_s28  ;;  %s521_s30 = sshll.u32 %s615_s29, 4  ;;  %s522_s30 = int_to_ptr.vmem [resolvable:$false] %s521_s30 }
  0x24   : > { %s523_s4 = scalar_lea.vmem %s522_s30, 1024  ;;  %p524_p9 = scmp.lt.s32.totalorder %s712_s8, %s522_s30 }
  0x25   : > { %p519_p5 = pnand %p517_p2, %p503_p3  ;;  %p525_p4 = scmp.lt.s32.totalorder %s523_s4, %s516_s28 }
  0x27   : > { %p520_p11 = pneg %p519_p5  ;;  %p526_p7 = por %p525_p4, %p524_p9 }
  0x29   : > { %p527_p10 = pnand %p526_p7, %p520_p11 }
  0x2b   : > { %530 = shalt.err (!%p527_p10)
}
  0x2c   : > { %s616_s5 = smov 256   ;;  %s617_s7 = smov 16  }
  0x2d   : > { %437 = dma.hbm_to_vmem [thread:$0]  (!%p716_p0), %s710_s6, 512, %s712_s8, %s721_s10, %s616_s5, %s616_s5, %s617_s7  }
  0x2e   : > { %p174_p12 = scmp.lt.s32.totalorder %s613_s17, 3  ;;  %p831_p1 = scmp.ge.s32.totalorder %s613_s17, 1 }
  0x30   : > { %p175_p3 = pnand %p831_p1, %p174_p12 }
  0x31   : > { %s753_s11 = sand.u32 (!%p175_p3), 1, %s597_s13  }
  0x32   : > { %178 = sbr.rel (%p175_p3) target bundleno = 311 (0x137), region = 32  ;;  %s416_s18 = sshll.u32 (!%p175_p3), %s753_s11, 5 }
  0x33   : > { %s181_s19 = scalar_lea.sflag (!%p175_p3), [#allocation3], %s753_s11  ;;  %s184_s21 = scalar_lea.vmem (!%p175_p3), [#allocation2], %s416_s18 }
  0x39   : > { %584 = dma.done.wait (%p688_p8), %s181_s19, 512  }
  0x3a   : > { %586 = vsyncadd (%p688_p8), %s181_s19, 4294966784  ;;  %v618_v0 = vmov 0.0   ;;  %v619_v1 = vmov 0   ;;  %v211_v2 = vld [vmem:[%s184_s21 + $0x8] sm:$0xff]  ;;  %v213_v3 = vld [vmem:[%s184_s21 + $0x18] sm:$0xff]  ;;  %vm220_vm0 = vcmask 130048  }
  0x3b   : > { %288 = vmatprep.mubr.f32.mxu0 %v618_v0  ;;  %496 = vset.pattern.permute.xlu0 %v619_v1  ;;  %v210_v4 = vld [vmem:[%s184_s21] sm:$0xff]  ;;  %v426_v5 = vpack.c.bf16 %v213_v3, %v211_v2  ;;  %v212_v6 = vld [vmem:[%s184_s21 + $0x10] sm:$0xff]  ;;  %s417_s10 = sshll.u32 %s753_s11, 4  ;;  %s425_s22 = sshll.u32 %s605_s15, 8 }
  0x3c   : > { %v214_v7 = vld [vmem:[%s823_s2] sm:$0xff]  ;;  %v428_v8 = vpack.c.bf16 %v212_v6, %v210_v4  ;;  %s206_s23 = scalar_lea.vmem [#allocation5], %s417_s10  ;;  %s772_s4 = scalar_lea.hbm %s824_s3, %s425_s22 }
  0x3d   : > { %217 = vperm.xlu0 %496, %v214_v7   ;;  %427 = vmatprep.subr.bf16.mxu0 %v426_v5  ;;  %v209_v9 = vld [vmem:[%s822_s1] sm:$0xff]  ;;  %s324_s28 = sshll.u32 %s206_s23, 4  ;;  %s308_s5 = scalar_lea.sflag [#allocation4], %s753_s11  ;;  %s774_s28 = int_to_ptr.vmem [resolvable:$true] %s324_s28 }
  0x3e   : > { %429 = vmatpush1.bf16.msra.mxu0 %v428_v8  ;;  %s531_s15 = scalar_lea.vmem %s774_s28, 256  ;;  %p832_p9 = scmp.ne.s32.totalorder %s828_s25, 0 }
  0x3f   : > { %p532_p8 = scmp.ne.s32.totalorder %s774_s28, %s531_s15  ;;  %s620_s7 = smov [#allocation5]  }
  0x40   : > { %s535_s18 = sshll.u32 %s620_s7, 4  ;;  %s536_s18 = int_to_ptr.vmem [resolvable:$false] %s535_s18 }
  0x41   : > { %418 = vmatmul.mubr.msk.f32.vlgmr.msra.gmra.mrb[0].mxu0 %vm220_vm0, %v209_v9  ;;  %p533_p11 = pnand %p532_p8, %p832_p9  ;;  %s537_s19 = scalar_lea.vmem %s536_s18, 512 }
  0x42   : > { %p538_p6 = scmp.lt.s32.totalorder %s774_s28, %s536_s18  ;;  %p539_p13 = scmp.lt.s32.totalorder %s537_s19, %s531_s15 }
  0x43   : > { %p534_p0 = pneg %p533_p11 }
  0x44   : > { %p540_p2 = por %p539_p13, %p538_p6 }
  0x46   : > { %p541_p5 = pnand %p540_p2, %p534_p0 }
  0xbc   : > { %v218_v10 = vpop.permute.xlu0 %217 }
 0x114   : > { %v290_v11 = vpop.f32.mrb[0].mxu0 }
 0x115   : > { %v291_v12 = vadd.f32 %v290_v11, %v218_v10  ;;  %v292_v13 = vpop.f32.mrb[1].mxu0 }
 0x116   : > { %v293_v14 = vadd.f32 %v292_v13, %v218_v10 }
 0x117   : > { %v297_v15 = vmul.f32 0.70710677, %v291_v12  ;;  %v295_v19 = vmul.f32 0.5, %v291_v12 }
 0x118   : > { %v298_v16 = vmul.f32 0.70710677, %v293_v14  ;;  %v296_v21 = vmul.f32 0.5, %v293_v14 }
 0x119   : > { %497 = verf.f32 %v297_v15 }
 0x11a   : > { %499 = verf.f32 %v298_v16 }
 0x123   : > { %v498_v17 = vpop.eup %497 }
 0x124   : > { %v500_v18 = vpop.eup %499  ;;  %v301_v20 = vadd.f32 1.0, %v498_v17 }
 0x125   : > { %v302_v22 = vadd.f32 1.0, %v500_v18 }
 0x126   : > { %v303_v23 = vmul.f32 %v301_v20, %v295_v19 }
 0x127   : > { %v304_v24 = vmul.f32 %v302_v22, %v296_v21 }
 0x128   : > { %305 = vst [vmem:[%s206_s23] sm:$0xff] %v303_v23 }
 0x129   : > { %306 = vst [vmem:[%s206_s23 + $0x8] sm:$0xff] %v304_v24 }
 0x12a   : > { %544 = shalt.err (!%p541_p5)
}
 0x12b   : > { %s545_s11 = scalar_lea.hbm %s772_s4, 256  ;;  %s549_s8 = scalar_lea.hbm %s824_s3, 512 }
 0x12c   : > { %p546_p4 = scmp.ne.s32.totalorder %s772_s4, %s545_s11  ;;  %p550_p12 = scmp.lt.u32.totalorder %s772_s4, %s824_s3 }
 0x12d   : > { %p551_p1 = scmp.lt.u32.totalorder %s549_s8, %s545_s11  ;;  %p553_p8 = scmp.lt.u32.totalorder %s545_s11, %s772_s4 }
 0x12e   : > { %p547_p7 = pnand %p546_p4, %p832_p9 }
 0x12f   : > { %p552_p3 = por %p551_p1, %p550_p12 }
 0x130   : > { %p548_p10 = pneg %p547_p7 }
 0x131   : > { %p554_p11 = por %p553_p8, %p552_p3 }
 0x133   : > { %p555_p0 = pnand %p554_p11, %p548_p10 }
 0x135   : > { %558 = shalt.err (!%p555_p0)
}
 0x136   : > { %432 = dma.vmem_to_hbm [thread:$0]  (%p832_p9), %s774_s28, 256, %s772_s4, %s308_s5  }
 0x137 PF: > { %s336_s10 = sand.u32 1, %s593_s12   ;;  %p833_p6 = scmp.ne.s32.totalorder %s829_s27, 0 }
 0x138   : > { %p834_p13 = scmp.ge.s32.totalorder %s613_s17, 2  ;;  %s337_s22 = scalar_lea.sflag [#allocation4], %s336_s10 }
 0x13a   : > { %p439_p2 = pnand %p834_p13, %p833_p6 }
 0x13c   : > { %588 = dma.done.wait (!%p439_p2), %s337_s22, 256  }
 0x13d   : > { %590 = vsyncadd (!%p439_p2), %s337_s22, 4294967040  ;;  %s19_s17 = sadd.s32 1, %s613_s17   ;;  %s835_s12 = smov %s597_s13 }
 0x13e   : > { %p16_p5 = scmp.ge.s32.totalorder %s19_s17, 4   ;;  %s836_s13 = smov %s601_s14 }
 0x13f   : > { %s837_s14 = smov %s697_s26  ;;  %s838_s15 = smov %s609_s16 }
 0x140   : > { %s839_s16 = smov %s841_s20  ;;  %18 = sbr.rel (!%p16_p5) target bundleno = 6 (0x6), region = 77 }
 0x147   :  { %342 = vsyncpa [#allocation3], 1 }
 0x148   :  { %344 = vsyncpa [#allocation3 + $0x1], 1 }
 0x149   :  { %345 = vsyncpa [#allocation4], 1 }
 0x14a   :  { %347 = vsyncpa [#allocation4 + $0x1], 1 }

</bundles_post_ra>
